<compile_context>
chip_gen: v7x
topology: tpu7x:2x2x1
jax: 0.10.0
libtpu: 0.0.40
codegen_flags: <defaults>
</compile_context>

<pallas_src>
import functools

import jax
import jax.numpy as jnp
from jax.experimental import pallas as pl
from jax.experimental.pallas import tpu as pltpu


def _round_up(v, m):
    return (v + m - 1) // m * m


def _pick_vmem_limit():
    """Generation-aware scoped-VMEM request (guarded: falls back to a safe value)."""
    try:
        info = pltpu.get_tpu_info()
        cap = getattr(info, "vmem_capacity_bytes", None)
        if cap:
            # Leave ~25% headroom for compiler scratch; cap at ~110 MiB (v5e/v6e).
            return min(int(cap) * 3 // 4, 110 * 1024 * 1024)
    except Exception:
        pass
    return 48 * 1024 * 1024  # safe on every generation (v7x has 64 MiB physical)


def _down_kernel(wp, pooled_ref, w1_ref, b1_ref, w2_ref, b2_ref,
                 wsc_ref, bsc_ref, wfc1_ref, wfc2_ref, o_ref):
    pooled = pooled_ref[0]                              # (C_in_p, HWp) f32
    hwp = pooled.shape[-1]

    # Flattened spatial position / column index (shared 3x3 edge masks).
    pos = jax.lax.broadcasted_iota(jnp.int32, (1, hwp), 1)
    col = pos % wp

    shifts, masks = [], []
    for ky in range(3):
        for kx in range(3):
            dy, dx = ky - 1, kx - 1
            s = dy * wp + dx
            valid = (pos + s >= 0) & (pos + s < hwp)    # top/bottom edge (row wrap)
            if dx == 1:
                valid = valid & (col < wp - 1)          # right edge
            elif dx == -1:
                valid = valid & (col > 0)               # left edge
            shifts.append(s)
            masks.append(valid)

    def im2col(x):
        # x: (C, HWp) f32  ->  (9*C, HWp) bf16, rows grouped as (tap, channel).
        slabs = []
        for s, valid in zip(shifts, masks):
            if s == 0:
                slabs.append(x)
            else:
                rolled = pltpu.roll(x, (-s) % hwp, axis=1)   # XLU, frees vld/vst slots
                slabs.append(jnp.where(valid, rolled, 0.0))
        return jnp.concatenate(slabs, axis=0).astype(jnp.bfloat16)

    # ---- ResBlock (BatchNorm folded into conv scale/bias, inference mode). ----
    # conv1 (+BN+ReLU): one MXU matmul, K = 9*C_in_p.
    h1 = jnp.dot(w1_ref[...], im2col(pooled),
                 preferred_element_type=jnp.float32) + b1_ref[...]
    h1 = jnp.maximum(h1, 0.0)                           # (C_mid_p, HWp)

    # conv2 (+BN): one MXU matmul, K = 9*C_mid_p.
    out1 = jnp.dot(w2_ref[...], im2col(h1),
                   preferred_element_type=jnp.float32) + b2_ref[...]
    # 1x1 shortcut conv (+BN).
    out2 = jnp.dot(wsc_ref[...], pooled.astype(jnp.bfloat16),
                   preferred_element_type=jnp.float32) + bsc_ref[...]
    r = jnp.maximum(out1 + out2, 0.0)                   # (C_out, HWp)

    # ---- SE_Block: squeeze -> FC -> ReLU -> FC -> sigmoid -> scale + residual. ----
    y = jnp.mean(r, axis=1, keepdims=True)              # (C_out, 1)
    hfc = jnp.maximum(jnp.dot(wfc1_ref[...], y,
                              preferred_element_type=jnp.float32), 0.0)
    pre = jnp.dot(wfc2_ref[...], hfc, preferred_element_type=jnp.float32)
    gate = pl.reciprocal(1.0 + jnp.exp(-pre), approx=True)   # sigmoid, EUP path

    o_ref[0] = (r * (1.0 + gate)).astype(o_ref.dtype)   # r*s + r


# TODO(synk): BatchNorm is applied in inference mode (running statistics folded into
# the preceding bias-free conv); training-mode batch statistics are not computed.
def _fold_bn(w_conv, gamma, beta, mean, var, eps=1e-5):
    a = gamma / jnp.sqrt(var + eps)                     # (C_out,)
    return w_conv * a[:, None, None, None], beta - mean * a


def down_forward(x, p):
    """Forward of Down(in_ch, out_ch): (N, C_in, H, W) -> (N, C_out, H//2, W//2)."""
    n, c_in, h, w = x.shape
    hp, wp = h // 2, w // 2
    hwp = hp * wp

    # Fold BatchNorms into conv scale / bias.
    w1f, b1f = _fold_bn(p["w1"], p["g1"], p["b1"], p["m1"], p["v1"])
    w2f, b2f = _fold_bn(p["w2"], p["g2"], p["b2"], p["m2"], p["v2"])
    wscf, bscf = _fold_bn(p["wsc"], p["gsc"], p["bsc"], p["msc"], p["vsc"])
    c_mid = w1f.shape[0]
    c_out = w2f.shape[0]
    mid_se = p["wfc1"].shape[0]

    # Pad channel dims to multiples of 8 so in-kernel sublane slabs / concatenation
    # are tile-aligned (zero weights on padded channels => identical math).
    c_in_p = _round_up(c_in, 8)
    c_mid_p = _round_up(c_mid, 8)

    def pad_oihw(wt, o_p, i_p):
        o, i = wt.shape[:2]
        return jnp.pad(wt, ((0, o_p - o), (0, i_p - i), (0, 0), (0, 0)))

    # im2col weight layout: (C_out, 9*C_in_p), column index = (ky*3+kx)*C_in_p + i.
    # Fed to the MXU as bf16; accumulation stays f32 inside the kernel.
    w1m = jnp.transpose(pad_oihw(w1f, c_mid_p, c_in_p), (0, 2, 3, 1)) \
             .reshape(c_mid_p, 9 * c_in_p).astype(jnp.bfloat16)
    w2m = jnp.transpose(pad_oihw(w2f, c_out, c_mid_p), (0, 2, 3, 1)) \
             .reshape(c_out, 9 * c_mid_p).astype(jnp.bfloat16)
    wscm = jnp.pad(wscf.reshape(c_out, c_in),
                   ((0, 0), (0, c_in_p - c_in))).astype(jnp.bfloat16)
    b1c = jnp.pad(b1f, (0, c_mid_p - c_mid)).reshape(c_mid_p, 1)
    b2c = b2f.reshape(c_out, 1)
    bscc = bscf.reshape(c_out, 1)

    # MaxPool2d(2): single fused XLA reduce -> quarter-size, single kernel input stream.
    pooled = x.reshape(n, c_in, hp, 2, wp, 2).max(axis=(3, 5)).reshape(n, c_in, hwp)
    pooled = jnp.pad(pooled, ((0, 0), (0, c_in_p - c_in), (0, 0)))

    kernel = functools.partial(_down_kernel, wp)
    const2 = lambda i: (0, 0)

    out_flat = pl.pallas_call(
        kernel,
        out_shape=jax.ShapeDtypeStruct((n, c_out, hwp), x.dtype),
        grid_spec=pltpu.PrefetchScalarGridSpec(
            num_scalar_prefetch=0,
            grid=(n,),
            in_specs=[
                pl.BlockSpec((1, c_in_p, hwp), lambda i: (i, 0, 0)),
                pl.BlockSpec((c_mid_p, 9 * c_in_p), const2),
                pl.BlockSpec((c_mid_p, 1), const2),
                pl.BlockSpec((c_out, 9 * c_mid_p), const2),
                pl.BlockSpec((c_out, 1), const2),
                pl.BlockSpec((c_out, c_in_p), const2),
                pl.BlockSpec((c_out, 1), const2),
                pl.BlockSpec((mid_se, c_out), const2),
                pl.BlockSpec((c_out, mid_se), const2),
            ],
            out_specs=pl.BlockSpec((1, c_out, hwp), lambda i: (i, 0, 0)),
        ),
        compiler_params=pltpu.CompilerParams(
            dimension_semantics=("parallel",),      # >= 2 batch steps -> both v7x TCs busy
            vmem_limit_bytes=_pick_vmem_limit(),
        ),
    )(pooled, w1m, b1c, w2m, b2c, wscm, bscc, p["wfc1"], p["wfc2"])

    return out_flat.reshape(n, c_out, hp, wp)


def down_reference(x, p, eps=1e-5):
    """Plain-JAX reference (same math as the PyTorch module, inference-mode BN)."""
    def bn(z, g, b, m, v):
        a = g / jnp.sqrt(v + eps)
        return z * a[None, :, None, None] + (b - m * a)[None, :, None, None]

    def conv(z, wt, pad):
        return jax.lax.conv_general_dilated(
            z, wt, window_strides=(1, 1), padding=[(pad, pad), (pad, pad)],
            dimension_numbers=("NCHW", "OIHW", "NCHW"),
            precision=jax.lax.Precision.HIGHEST)

    n, c, h, w = x.shape
    xp = x.reshape(n, c, h // 2, 2, w // 2, 2).max(axis=(3, 5))
    h1 = jax.nn.relu(bn(conv(xp, p["w1"], 1), p["g1"], p["b1"], p["m1"], p["v1"]))
    o1 = bn(conv(h1, p["w2"], 1), p["g2"], p["b2"], p["m2"], p["v2"])
    o2 = bn(conv(xp, p["wsc"], 0), p["gsc"], p["bsc"], p["msc"], p["vsc"])
    r = jax.nn.relu(o1 + o2)
    y = r.mean(axis=(2, 3))                               # (N, C_out)
    hfc = jax.nn.relu(y @ p["wfc1"].T)
    s = jax.nn.sigmoid(hfc @ p["wfc2"].T)
    return r * s[:, :, None, None] + r


if __name__ == "__main__":
    key = jax.random.PRNGKey(0)
    ks = jax.random.split(key, 18)

    N, C_IN, C_OUT, H, W = 2, 4, 16, 16, 16
    C_MID = C_OUT            # ResBlock default: mid_channels = out_channels
    MID_SE = C_OUT // 8      # SE_Block reduction = 8

    x = jax.random.normal(ks[0], (N, C_IN, H, W), dtype=jnp.float32)

    def bn_params(k0, k1, k2, k3, c):
        return (1.0 + 0.1 * jax.random.normal(k0, (c,), jnp.float32),   # gamma
                0.1 * jax.random.normal(k1, (c,), jnp.float32),         # beta
                0.1 * jax.random.normal(k2, (c,), jnp.float32),         # running mean
                jax.random.uniform(k3, (c,), jnp.float32, 0.5, 1.5))    # running var

    g1, b1, m1, v1 = bn_params(ks[2], ks[3], ks[4], ks[5], C_MID)
    g2, b2, m2, v2 = bn_params(ks[7], ks[8], ks[9], ks[10], C_OUT)
    gsc, bsc, msc, vsc = bn_params(ks[12], ks[13], ks[14], ks[15], C_OUT)

    p = {
        "w1": 0.1 * jax.random.normal(ks[1], (C_MID, C_IN, 3, 3), jnp.float32),
        "g1": g1, "b1": b1, "m1": m1, "v1": v1,
        "w2": 0.1 * jax.random.normal(ks[6], (C_OUT, C_MID, 3, 3), jnp.float32),
        "g2": g2, "b2": b2, "m2": m2, "v2": v2,
        "wsc": 0.1 * jax.random.normal(ks[11], (C_OUT, C_IN, 1, 1), jnp.float32),
        "gsc": gsc, "bsc": bsc, "msc": msc, "vsc": vsc,
        "wfc1": 0.1 * jax.random.normal(ks[16], (MID_SE, C_OUT), jnp.float32),
        "wfc2": 0.1 * jax.random.normal(ks[17], (C_OUT, MID_SE), jnp.float32),
    }

    out = jax.jit(down_forward)(x, p)
    jax.block_until_ready(out)

    ref = down_reference(x, p)
    assert out.shape == (N, C_OUT, H // 2, W // 2)
    err = float(jnp.max(jnp.abs(out - ref)))
    # bf16 MXU feeds (f32 accumulation) => slightly looser tolerance than pure-f32.
    assert jnp.allclose(out, ref, atol=5e-2, rtol=5e-2), f"max abs err = {err}"

    print("KERNEL_OK")
</pallas_src>

<mosaic_0001>
module attributes {stable_mosaic.version = 11 : i64} {
  func.func @_down_kernel(%arg0: i32, %arg1: memref<1x8x64xf32, #tpu.memory_space<vmem>>, %arg2: memref<16x72xbf16, #tpu.memory_space<vmem>>, %arg3: memref<16x1xf32, #tpu.memory_space<vmem>>, %arg4: memref<16x144xbf16, #tpu.memory_space<vmem>>, %arg5: memref<16x1xf32, #tpu.memory_space<vmem>>, %arg6: memref<16x8xbf16, #tpu.memory_space<vmem>>, %arg7: memref<16x1xf32, #tpu.memory_space<vmem>>, %arg8: memref<2x16xf32, #tpu.memory_space<vmem>>, %arg9: memref<16x2xf32, #tpu.memory_space<vmem>>, %arg10: memref<1x16x64xf32, #tpu.memory_space<vmem>>) attributes {dimension_semantics = [#tpu.dimension_semantics<parallel>], iteration_bounds = array<i64: 2>, scalar_prefetch = 0 : i64, scratch_operands = 0 : i64, tpu.core_type = #tpu.core_type<tc>, window_params = [{transform_indices = @transform_0, window_bounds = array<i64: 1, 8, 64>}, {pipeline_mode = #tpu.pipeline_mode<synchronous>, transform_indices = @transform_1, window_bounds = array<i64: 16, 72>}, {pipeline_mode = #tpu.pipeline_mode<synchronous>, transform_indices = @transform_2, window_bounds = array<i64: 16, 1>}, {pipeline_mode = #tpu.pipeline_mode<synchronous>, transform_indices = @transform_3, window_bounds = array<i64: 16, 144>}, {pipeline_mode = #tpu.pipeline_mode<synchronous>, transform_indices = @transform_4, window_bounds = array<i64: 16, 1>}, {pipeline_mode = #tpu.pipeline_mode<synchronous>, transform_indices = @transform_5, window_bounds = array<i64: 16, 8>}, {pipeline_mode = #tpu.pipeline_mode<synchronous>, transform_indices = @transform_6, window_bounds = array<i64: 16, 1>}, {pipeline_mode = #tpu.pipeline_mode<synchronous>, transform_indices = @transform_7, window_bounds = array<i64: 2, 16>}, {pipeline_mode = #tpu.pipeline_mode<synchronous>, transform_indices = @transform_8, window_bounds = array<i64: 16, 2>}, {transform_indices = @transform_9, window_bounds = array<i64: 1, 16, 64>}]} {
    %c0 = arith.constant 0 : index
    %c0_0 = arith.constant 0 : index
    %c0_1 = arith.constant 0 : index
    %0 = vector.load %arg1[%c0, %c0_0, %c0_1] : memref<1x8x64xf32, #tpu.memory_space<vmem>>, vector<1x8x64xf32>
    %1 = vector.shape_cast %0 : vector<1x8x64xf32> to vector<8x64xf32>
    %2 = tpu.iota {dimensions = array<i32: 1>} : vector<1x64xi32>
    %c8_i32 = arith.constant 8 : i32
    %c0_i32 = arith.constant 0 : i32
    %3 = arith.cmpi eq, %c8_i32, %c0_i32 : i32
    %c1_i32 = arith.constant 1 : i32
    %4 = arith.select %3, %c1_i32, %c8_i32 : i32
    %5 = vector.broadcast %4 : i32 to vector<1x64xi32>
    %6 = arith.remsi %2, %5 : vector<1x64xi32>
    %c0_i32_2 = arith.constant 0 : i32
    %7 = vector.broadcast %c0_i32_2 : i32 to vector<1x64xi32>
    %8 = arith.cmpi ne, %6, %7 : vector<1x64xi32>
    %c0_i32_3 = arith.constant 0 : i32
    %9 = vector.broadcast %c0_i32_3 : i32 to vector<1x64xi32>
    %10 = arith.cmpi slt, %6, %9 : vector<1x64xi32>
    %c0_i32_4 = arith.constant 0 : i32
    %11 = arith.cmpi slt, %4, %c0_i32_4 : i32
    %12 = vector.broadcast %11 : i1 to vector<1x64xi1>
    %13 = vector.broadcast %12 : vector<1x64xi1> to vector<1x64xi1>
    %14 = arith.xori %10, %13 : vector<1x64xi1>
    %15 = arith.andi %14, %8 : vector<1x64xi1>
    %16 = vector.broadcast %4 : i32 to vector<1x64xi32>
    %17 = arith.addi %6, %16 : vector<1x64xi32>
    %18 = arith.select %15, %17, %6 : vector<1x64xi1>, vector<1x64xi32>
    %c-9_i32 = arith.constant -9 : i32
    %19 = vector.broadcast %c-9_i32 : i32 to vector<1x64xi32>
    %20 = arith.addi %2, %19 : vector<1x64xi32>
    %c0_i32_5 = arith.constant 0 : i32
    %21 = vector.broadcast %c0_i32_5 : i32 to vector<1x64xi32>
    %22 = arith.cmpi sge, %20, %21 : vector<1x64xi32>
    %c-9_i32_6 = arith.constant -9 : i32
    %23 = vector.broadcast %c-9_i32_6 : i32 to vector<1x64xi32>
    %24 = arith.addi %2, %23 : vector<1x64xi32>
    %c64_i32 = arith.constant 64 : i32
    %25 = vector.broadcast %c64_i32 : i32 to vector<1x64xi32>
    %26 = arith.cmpi slt, %24, %25 : vector<1x64xi32>
    %27 = arith.andi %22, %26 : vector<1x64xi1>
    %c0_i32_7 = arith.constant 0 : i32
    %28 = vector.broadcast %c0_i32_7 : i32 to vector<1x64xi32>
    %29 = arith.cmpi sgt, %18, %28 : vector<1x64xi32>
    %30 = arith.andi %27, %29 : vector<1x64xi1>
    %c-8_i32 = arith.constant -8 : i32
    %31 = vector.broadcast %c-8_i32 : i32 to vector<1x64xi32>
    %32 = arith.addi %2, %31 : vector<1x64xi32>
    %c0_i32_8 = arith.constant 0 : i32
    %33 = vector.broadcast %c0_i32_8 : i32 to vector<1x64xi32>
    %34 = arith.cmpi sge, %32, %33 : vector<1x64xi32>
    %c-8_i32_9 = arith.constant -8 : i32
    %35 = vector.broadcast %c-8_i32_9 : i32 to vector<1x64xi32>
    %36 = arith.addi %2, %35 : vector<1x64xi32>
    %c64_i32_10 = arith.constant 64 : i32
    %37 = vector.broadcast %c64_i32_10 : i32 to vector<1x64xi32>
    %38 = arith.cmpi slt, %36, %37 : vector<1x64xi32>
    %39 = arith.andi %34, %38 : vector<1x64xi1>
    %c-7_i32 = arith.constant -7 : i32
    %40 = vector.broadcast %c-7_i32 : i32 to vector<1x64xi32>
    %41 = arith.addi %2, %40 : vector<1x64xi32>
    %c0_i32_11 = arith.constant 0 : i32
    %42 = vector.broadcast %c0_i32_11 : i32 to vector<1x64xi32>
    %43 = arith.cmpi sge, %41, %42 : vector<1x64xi32>
    %c-7_i32_12 = arith.constant -7 : i32
    %44 = vector.broadcast %c-7_i32_12 : i32 to vector<1x64xi32>
    %45 = arith.addi %2, %44 : vector<1x64xi32>
    %c64_i32_13 = arith.constant 64 : i32
    %46 = vector.broadcast %c64_i32_13 : i32 to vector<1x64xi32>
    %47 = arith.cmpi slt, %45, %46 : vector<1x64xi32>
    %48 = arith.andi %43, %47 : vector<1x64xi1>
    %c7_i32 = arith.constant 7 : i32
    %49 = vector.broadcast %c7_i32 : i32 to vector<1x64xi32>
    %50 = arith.cmpi slt, %18, %49 : vector<1x64xi32>
    %51 = arith.andi %48, %50 : vector<1x64xi1>
    %c-1_i32 = arith.constant -1 : i32
    %52 = vector.broadcast %c-1_i32 : i32 to vector<1x64xi32>
    %53 = arith.addi %2, %52 : vector<1x64xi32>
    %c0_i32_14 = arith.constant 0 : i32
    %54 = vector.broadcast %c0_i32_14 : i32 to vector<1x64xi32>
    %55 = arith.cmpi sge, %53, %54 : vector<1x64xi32>
    %c-1_i32_15 = arith.constant -1 : i32
    %56 = vector.broadcast %c-1_i32_15 : i32 to vector<1x64xi32>
    %57 = arith.addi %2, %56 : vector<1x64xi32>
    %c64_i32_16 = arith.constant 64 : i32
    %58 = vector.broadcast %c64_i32_16 : i32 to vector<1x64xi32>
    %59 = arith.cmpi slt, %57, %58 : vector<1x64xi32>
    %60 = arith.andi %55, %59 : vector<1x64xi1>
    %c0_i32_17 = arith.constant 0 : i32
    %61 = vector.broadcast %c0_i32_17 : i32 to vector<1x64xi32>
    %62 = arith.cmpi sgt, %18, %61 : vector<1x64xi32>
    %63 = arith.andi %60, %62 : vector<1x64xi1>
    %c1_i32_18 = arith.constant 1 : i32
    %64 = vector.broadcast %c1_i32_18 : i32 to vector<1x64xi32>
    %65 = arith.addi %2, %64 : vector<1x64xi32>
    %c0_i32_19 = arith.constant 0 : i32
    %66 = vector.broadcast %c0_i32_19 : i32 to vector<1x64xi32>
    %67 = arith.cmpi sge, %65, %66 : vector<1x64xi32>
    %c1_i32_20 = arith.constant 1 : i32
    %68 = vector.broadcast %c1_i32_20 : i32 to vector<1x64xi32>
    %69 = arith.addi %2, %68 : vector<1x64xi32>
    %c64_i32_21 = arith.constant 64 : i32
    %70 = vector.broadcast %c64_i32_21 : i32 to vector<1x64xi32>
    %71 = arith.cmpi slt, %69, %70 : vector<1x64xi32>
    %72 = arith.andi %67, %71 : vector<1x64xi1>
    %c7_i32_22 = arith.constant 7 : i32
    %73 = vector.broadcast %c7_i32_22 : i32 to vector<1x64xi32>
    %74 = arith.cmpi slt, %18, %73 : vector<1x64xi32>
    %75 = arith.andi %72, %74 : vector<1x64xi1>
    %c7_i32_23 = arith.constant 7 : i32
    %76 = vector.broadcast %c7_i32_23 : i32 to vector<1x64xi32>
    %77 = arith.addi %2, %76 : vector<1x64xi32>
    %c0_i32_24 = arith.constant 0 : i32
    %78 = vector.broadcast %c0_i32_24 : i32 to vector<1x64xi32>
    %79 = arith.cmpi sge, %77, %78 : vector<1x64xi32>
    %c7_i32_25 = arith.constant 7 : i32
    %80 = vector.broadcast %c7_i32_25 : i32 to vector<1x64xi32>
    %81 = arith.addi %2, %80 : vector<1x64xi32>
    %c64_i32_26 = arith.constant 64 : i32
    %82 = vector.broadcast %c64_i32_26 : i32 to vector<1x64xi32>
    %83 = arith.cmpi slt, %81, %82 : vector<1x64xi32>
    %84 = arith.andi %79, %83 : vector<1x64xi1>
    %c0_i32_27 = arith.constant 0 : i32
    %85 = vector.broadcast %c0_i32_27 : i32 to vector<1x64xi32>
    %86 = arith.cmpi sgt, %18, %85 : vector<1x64xi32>
    %87 = arith.andi %84, %86 : vector<1x64xi1>
    %c8_i32_28 = arith.constant 8 : i32
    %88 = vector.broadcast %c8_i32_28 : i32 to vector<1x64xi32>
    %89 = arith.addi %2, %88 : vector<1x64xi32>
    %c0_i32_29 = arith.constant 0 : i32
    %90 = vector.broadcast %c0_i32_29 : i32 to vector<1x64xi32>
    %91 = arith.cmpi sge, %89, %90 : vector<1x64xi32>
    %c8_i32_30 = arith.constant 8 : i32
    %92 = vector.broadcast %c8_i32_30 : i32 to vector<1x64xi32>
    %93 = arith.addi %2, %92 : vector<1x64xi32>
    %c64_i32_31 = arith.constant 64 : i32
    %94 = vector.broadcast %c64_i32_31 : i32 to vector<1x64xi32>
    %95 = arith.cmpi slt, %93, %94 : vector<1x64xi32>
    %96 = arith.andi %91, %95 : vector<1x64xi1>
    %c9_i32 = arith.constant 9 : i32
    %97 = vector.broadcast %c9_i32 : i32 to vector<1x64xi32>
    %98 = arith.addi %2, %97 : vector<1x64xi32>
    %c0_i32_32 = arith.constant 0 : i32
    %99 = vector.broadcast %c0_i32_32 : i32 to vector<1x64xi32>
    %100 = arith.cmpi sge, %98, %99 : vector<1x64xi32>
    %c9_i32_33 = arith.constant 9 : i32
    %101 = vector.broadcast %c9_i32_33 : i32 to vector<1x64xi32>
    %102 = arith.addi %2, %101 : vector<1x64xi32>
    %c64_i32_34 = arith.constant 64 : i32
    %103 = vector.broadcast %c64_i32_34 : i32 to vector<1x64xi32>
    %104 = arith.cmpi slt, %102, %103 : vector<1x64xi32>
    %105 = arith.andi %100, %104 : vector<1x64xi1>
    %c7_i32_35 = arith.constant 7 : i32
    %106 = vector.broadcast %c7_i32_35 : i32 to vector<1x64xi32>
    %107 = arith.cmpi slt, %18, %106 : vector<1x64xi32>
    %108 = arith.andi %105, %107 : vector<1x64xi1>
    %c0_36 = arith.constant 0 : index
    %c0_37 = arith.constant 0 : index
    %109 = vector.load %arg2[%c0_36, %c0_37] : memref<16x72xbf16, #tpu.memory_space<vmem>>, vector<16x72xbf16>
    %c9_i32_38 = arith.constant 9 : i32
    %110 = tpu.dynamic_rotate %1 by %c9_i32_38 dim 1 : vector<8x64xf32>, i32 -> vector<8x64xf32>
    %cst = arith.constant 0.000000e+00 : f32
    %111 = vector.shape_cast %30 : vector<1x64xi1> to vector<1x64xi1>
    %112 = vector.broadcast %111 : vector<1x64xi1> to vector<8x64xi1>
    %113 = vector.broadcast %cst : f32 to vector<8x64xf32>
    %114 = arith.select %112, %110, %113 : vector<8x64xi1>, vector<8x64xf32>
    %c8_i32_39 = arith.constant 8 : i32
    %115 = tpu.dynamic_rotate %1 by %c8_i32_39 dim 1 : vector<8x64xf32>, i32 -> vector<8x64xf32>
    %cst_40 = arith.constant 0.000000e+00 : f32
    %116 = vector.shape_cast %39 : vector<1x64xi1> to vector<1x64xi1>
    %117 = vector.broadcast %116 : vector<1x64xi1> to vector<8x64xi1>
    %118 = vector.broadcast %cst_40 : f32 to vector<8x64xf32>
    %119 = arith.select %117, %115, %118 : vector<8x64xi1>, vector<8x64xf32>
    %c7_i32_41 = arith.constant 7 : i32
    %120 = tpu.dynamic_rotate %1 by %c7_i32_41 dim 1 : vector<8x64xf32>, i32 -> vector<8x64xf32>
    %cst_42 = arith.constant 0.000000e+00 : f32
    %121 = vector.shape_cast %51 : vector<1x64xi1> to vector<1x64xi1>
    %122 = vector.broadcast %121 : vector<1x64xi1> to vector<8x64xi1>
    %123 = vector.broadcast %cst_42 : f32 to vector<8x64xf32>
    %124 = arith.select %122, %120, %123 : vector<8x64xi1>, vector<8x64xf32>
    %c1_i32_43 = arith.constant 1 : i32
    %125 = tpu.dynamic_rotate %1 by %c1_i32_43 dim 1 : vector<8x64xf32>, i32 -> vector<8x64xf32>
    %cst_44 = arith.constant 0.000000e+00 : f32
    %126 = vector.shape_cast %63 : vector<1x64xi1> to vector<1x64xi1>
    %127 = vector.broadcast %126 : vector<1x64xi1> to vector<8x64xi1>
    %128 = vector.broadcast %cst_44 : f32 to vector<8x64xf32>
    %129 = arith.select %127, %125, %128 : vector<8x64xi1>, vector<8x64xf32>
    %c63_i32 = arith.constant 63 : i32
    %130 = tpu.dynamic_rotate %1 by %c63_i32 dim 1 : vector<8x64xf32>, i32 -> vector<8x64xf32>
    %cst_45 = arith.constant 0.000000e+00 : f32
    %131 = vector.shape_cast %75 : vector<1x64xi1> to vector<1x64xi1>
    %132 = vector.broadcast %131 : vector<1x64xi1> to vector<8x64xi1>
    %133 = vector.broadcast %cst_45 : f32 to vector<8x64xf32>
    %134 = arith.select %132, %130, %133 : vector<8x64xi1>, vector<8x64xf32>
    %c57_i32 = arith.constant 57 : i32
    %135 = tpu.dynamic_rotate %1 by %c57_i32 dim 1 : vector<8x64xf32>, i32 -> vector<8x64xf32>
    %cst_46 = arith.constant 0.000000e+00 : f32
    %136 = vector.shape_cast %87 : vector<1x64xi1> to vector<1x64xi1>
    %137 = vector.broadcast %136 : vector<1x64xi1> to vector<8x64xi1>
    %138 = vector.broadcast %cst_46 : f32 to vector<8x64xf32>
    %139 = arith.select %137, %135, %138 : vector<8x64xi1>, vector<8x64xf32>
    %c56_i32 = arith.constant 56 : i32
    %140 = tpu.dynamic_rotate %1 by %c56_i32 dim 1 : vector<8x64xf32>, i32 -> vector<8x64xf32>
    %cst_47 = arith.constant 0.000000e+00 : f32
    %141 = vector.shape_cast %96 : vector<1x64xi1> to vector<1x64xi1>
    %142 = vector.broadcast %141 : vector<1x64xi1> to vector<8x64xi1>
    %143 = vector.broadcast %cst_47 : f32 to vector<8x64xf32>
    %144 = arith.select %142, %140, %143 : vector<8x64xi1>, vector<8x64xf32>
    %c55_i32 = arith.constant 55 : i32
    %145 = tpu.dynamic_rotate %1 by %c55_i32 dim 1 : vector<8x64xf32>, i32 -> vector<8x64xf32>
    %cst_48 = arith.constant 0.000000e+00 : f32
    %146 = vector.shape_cast %108 : vector<1x64xi1> to vector<1x64xi1>
    %147 = vector.broadcast %146 : vector<1x64xi1> to vector<8x64xi1>
    %148 = vector.broadcast %cst_48 : f32 to vector<8x64xf32>
    %149 = arith.select %147, %145, %148 : vector<8x64xi1>, vector<8x64xf32>
    %150 = tpu.concatenate %114, %119, %124, %129, %1, %134, %139, %144, %149 in 0 : vector<8x64xf32>, vector<8x64xf32>, vector<8x64xf32>, vector<8x64xf32>, vector<8x64xf32>, vector<8x64xf32>, vector<8x64xf32>, vector<8x64xf32>, vector<8x64xf32> -> vector<72x64xf32>
    %151 = arith.truncf %150 : vector<72x64xf32> to vector<72x64xbf16>
    %cst_49 = arith.constant dense<0.000000e+00> : vector<16x64xf32>
    %152 = tpu.matmul %109, %151, %cst_49 {dimension_numbers = #tpu.dot_dimension_numbers<[1], [0], [0], [1], [0, 0, 1, 1], [], []>} : vector<16x72xbf16>, vector<72x64xbf16>, vector<16x64xf32> -> vector<16x64xf32>
    %c0_50 = arith.constant 0 : index
    %c0_51 = arith.constant 0 : index
    %153 = vector.load %arg3[%c0_50, %c0_51] : memref<16x1xf32, #tpu.memory_space<vmem>>, vector<16x1xf32>
    %154 = vector.broadcast %153 : vector<16x1xf32> to vector<16x64xf32>
    %155 = arith.addf %152, %154 : vector<16x64xf32>
    %cst_52 = arith.constant 0.000000e+00 : f32
    %156 = vector.broadcast %cst_52 : f32 to vector<16x64xf32>
    %157 = arith.maximumf %155, %156 : vector<16x64xf32>
    %c0_53 = arith.constant 0 : index
    %c0_54 = arith.constant 0 : index
    %158 = vector.load %arg4[%c0_53, %c0_54] : memref<16x144xbf16, #tpu.memory_space<vmem>>, vector<16x144xbf16>
    %c9_i32_55 = arith.constant 9 : i32
    %159 = tpu.dynamic_rotate %157 by %c9_i32_55 dim 1 : vector<16x64xf32>, i32 -> vector<16x64xf32>
    %cst_56 = arith.constant 0.000000e+00 : f32
    %160 = vector.shape_cast %30 : vector<1x64xi1> to vector<1x64xi1>
    %161 = vector.broadcast %160 : vector<1x64xi1> to vector<16x64xi1>
    %162 = vector.broadcast %cst_56 : f32 to vector<16x64xf32>
    %163 = arith.select %161, %159, %162 : vector<16x64xi1>, vector<16x64xf32>
    %c8_i32_57 = arith.constant 8 : i32
    %164 = tpu.dynamic_rotate %157 by %c8_i32_57 dim 1 : vector<16x64xf32>, i32 -> vector<16x64xf32>
    %cst_58 = arith.constant 0.000000e+00 : f32
    %165 = vector.shape_cast %39 : vector<1x64xi1> to vector<1x64xi1>
    %166 = vector.broadcast %165 : vector<1x64xi1> to vector<16x64xi1>
    %167 = vector.broadcast %cst_58 : f32 to vector<16x64xf32>
    %168 = arith.select %166, %164, %167 : vector<16x64xi1>, vector<16x64xf32>
    %c7_i32_59 = arith.constant 7 : i32
    %169 = tpu.dynamic_rotate %157 by %c7_i32_59 dim 1 : vector<16x64xf32>, i32 -> vector<16x64xf32>
    %cst_60 = arith.constant 0.000000e+00 : f32
    %170 = vector.shape_cast %51 : vector<1x64xi1> to vector<1x64xi1>
    %171 = vector.broadcast %170 : vector<1x64xi1> to vector<16x64xi1>
    %172 = vector.broadcast %cst_60 : f32 to vector<16x64xf32>
    %173 = arith.select %171, %169, %172 : vector<16x64xi1>, vector<16x64xf32>
    %c1_i32_61 = arith.constant 1 : i32
    %174 = tpu.dynamic_rotate %157 by %c1_i32_61 dim 1 : vector<16x64xf32>, i32 -> vector<16x64xf32>
    %cst_62 = arith.constant 0.000000e+00 : f32
    %175 = vector.shape_cast %63 : vector<1x64xi1> to vector<1x64xi1>
    %176 = vector.broadcast %175 : vector<1x64xi1> to vector<16x64xi1>
    %177 = vector.broadcast %cst_62 : f32 to vector<16x64xf32>
    %178 = arith.select %176, %174, %177 : vector<16x64xi1>, vector<16x64xf32>
    %c63_i32_63 = arith.constant 63 : i32
    %179 = tpu.dynamic_rotate %157 by %c63_i32_63 dim 1 : vector<16x64xf32>, i32 -> vector<16x64xf32>
    %cst_64 = arith.constant 0.000000e+00 : f32
    %180 = vector.shape_cast %75 : vector<1x64xi1> to vector<1x64xi1>
    %181 = vector.broadcast %180 : vector<1x64xi1> to vector<16x64xi1>
    %182 = vector.broadcast %cst_64 : f32 to vector<16x64xf32>
    %183 = arith.select %181, %179, %182 : vector<16x64xi1>, vector<16x64xf32>
    %c57_i32_65 = arith.constant 57 : i32
    %184 = tpu.dynamic_rotate %157 by %c57_i32_65 dim 1 : vector<16x64xf32>, i32 -> vector<16x64xf32>
    %cst_66 = arith.constant 0.000000e+00 : f32
    %185 = vector.shape_cast %87 : vector<1x64xi1> to vector<1x64xi1>
    %186 = vector.broadcast %185 : vector<1x64xi1> to vector<16x64xi1>
    %187 = vector.broadcast %cst_66 : f32 to vector<16x64xf32>
    %188 = arith.select %186, %184, %187 : vector<16x64xi1>, vector<16x64xf32>
    %c56_i32_67 = arith.constant 56 : i32
    %189 = tpu.dynamic_rotate %157 by %c56_i32_67 dim 1 : vector<16x64xf32>, i32 -> vector<16x64xf32>
    %cst_68 = arith.constant 0.000000e+00 : f32
    %190 = vector.shape_cast %96 : vector<1x64xi1> to vector<1x64xi1>
    %191 = vector.broadcast %190 : vector<1x64xi1> to vector<16x64xi1>
    %192 = vector.broadcast %cst_68 : f32 to vector<16x64xf32>
    %193 = arith.select %191, %189, %192 : vector<16x64xi1>, vector<16x64xf32>
    %c55_i32_69 = arith.constant 55 : i32
    %194 = tpu.dynamic_rotate %157 by %c55_i32_69 dim 1 : vector<16x64xf32>, i32 -> vector<16x64xf32>
    %cst_70 = arith.constant 0.000000e+00 : f32
    %195 = vector.shape_cast %108 : vector<1x64xi1> to vector<1x64xi1>
    %196 = vector.broadcast %195 : vector<1x64xi1> to vector<16x64xi1>
    %197 = vector.broadcast %cst_70 : f32 to vector<16x64xf32>
    %198 = arith.select %196, %194, %197 : vector<16x64xi1>, vector<16x64xf32>
    %199 = tpu.concatenate %163, %168, %173, %178, %157, %183, %188, %193, %198 in 0 : vector<16x64xf32>, vector<16x64xf32>, vector<16x64xf32>, vector<16x64xf32>, vector<16x64xf32>, vector<16x64xf32>, vector<16x64xf32>, vector<16x64xf32>, vector<16x64xf32> -> vector<144x64xf32>
    %200 = arith.truncf %199 : vector<144x64xf32> to vector<144x64xbf16>
    %cst_71 = arith.constant dense<0.000000e+00> : vector<16x64xf32>
    %201 = tpu.matmul %158, %200, %cst_71 {dimension_numbers = #tpu.dot_dimension_numbers<[1], [0], [0], [1], [0, 0, 1, 1], [], []>} : vector<16x144xbf16>, vector<144x64xbf16>, vector<16x64xf32> -> vector<16x64xf32>
    %c0_72 = arith.constant 0 : index
    %c0_73 = arith.constant 0 : index
    %202 = vector.load %arg5[%c0_72, %c0_73] : memref<16x1xf32, #tpu.memory_space<vmem>>, vector<16x1xf32>
    %203 = vector.broadcast %202 : vector<16x1xf32> to vector<16x64xf32>
    %204 = arith.addf %201, %203 : vector<16x64xf32>
    %c0_74 = arith.constant 0 : index
    %c0_75 = arith.constant 0 : index
    %205 = vector.load %arg6[%c0_74, %c0_75] : memref<16x8xbf16, #tpu.memory_space<vmem>>, vector<16x8xbf16>
    %206 = arith.truncf %1 : vector<8x64xf32> to vector<8x64xbf16>
    %cst_76 = arith.constant dense<0.000000e+00> : vector<16x64xf32>
    %207 = tpu.matmul %205, %206, %cst_76 {dimension_numbers = #tpu.dot_dimension_numbers<[1], [0], [0], [1], [0, 0, 1, 1], [], []>} : vector<16x8xbf16>, vector<8x64xbf16>, vector<16x64xf32> -> vector<16x64xf32>
    %c0_77 = arith.constant 0 : index
    %c0_78 = arith.constant 0 : index
    %208 = vector.load %arg7[%c0_77, %c0_78] : memref<16x1xf32, #tpu.memory_space<vmem>>, vector<16x1xf32>
    %209 = vector.broadcast %208 : vector<16x1xf32> to vector<16x64xf32>
    %210 = arith.addf %207, %209 : vector<16x64xf32>
    %211 = arith.addf %204, %210 : vector<16x64xf32>
    %cst_79 = arith.constant 0.000000e+00 : f32
    %212 = vector.broadcast %cst_79 : f32 to vector<16x64xf32>
    %213 = arith.maximumf %211, %212 : vector<16x64xf32>
    %cst_80 = arith.constant dense<0.000000e+00> : vector<16xf32>
    %214 = vector.multi_reduction <add>, %213, %cst_80 [1] : vector<16x64xf32> to vector<16xf32>
    %215 = vector.shape_cast %214 : vector<16xf32> to vector<16x1xf32>
    %cst_81 = arith.constant 6.400000e+01 : f32
    %216 = vector.broadcast %cst_81 : f32 to vector<16x1xf32>
    %217 = arith.divf %215, %216 : vector<16x1xf32>
    %c0_82 = arith.constant 0 : index
    %c0_83 = arith.constant 0 : index
    %218 = vector.load %arg8[%c0_82, %c0_83] : memref<2x16xf32, #tpu.memory_space<vmem>>, vector<2x16xf32>
    %cst_84 = arith.constant dense<0.000000e+00> : vector<2x1xf32>
    %219 = tpu.matmul %218, %217, %cst_84 {dimension_numbers = #tpu.dot_dimension_numbers<[1], [0], [0], [1], [0, 0, 1, 1], [], []>} : vector<2x16xf32>, vector<16x1xf32>, vector<2x1xf32> -> vector<2x1xf32>
    %cst_85 = arith.constant 0.000000e+00 : f32
    %220 = vector.broadcast %cst_85 : f32 to vector<2x1xf32>
    %221 = arith.maximumf %219, %220 : vector<2x1xf32>
    %c0_86 = arith.constant 0 : index
    %c0_87 = arith.constant 0 : index
    %222 = vector.load %arg9[%c0_86, %c0_87] : memref<16x2xf32, #tpu.memory_space<vmem>>, vector<16x2xf32>
    %cst_88 = arith.constant dense<0.000000e+00> : vector<16x1xf32>
    %223 = tpu.matmul %222, %221, %cst_88 {dimension_numbers = #tpu.dot_dimension_numbers<[1], [0], [0], [1], [0, 0, 1, 1], [], []>} : vector<16x2xf32>, vector<2x1xf32>, vector<16x1xf32> -> vector<16x1xf32>
    %cst_89 = arith.constant 0.000000e+00 : f32
    %224 = vector.broadcast %cst_89 : f32 to vector<16x1xf32>
    %225 = arith.subf %224, %223 : vector<16x1xf32>
    %226 = math.exp %225 : vector<16x1xf32>
    %cst_90 = arith.constant 1.000000e+00 : f32
    %227 = vector.broadcast %cst_90 : f32 to vector<16x1xf32>
    %228 = arith.addf %227, %226 : vector<16x1xf32>
    %229 = tpu.reciprocal %228 {approx = true} : vector<16x1xf32> -> vector<16x1xf32>
    %cst_91 = arith.constant 1.000000e+00 : f32
    %230 = vector.broadcast %cst_91 : f32 to vector<16x1xf32>
    %231 = arith.addf %230, %229 : vector<16x1xf32>
    %232 = vector.broadcast %231 : vector<16x1xf32> to vector<16x64xf32>
    %233 = arith.mulf %213, %232 : vector<16x64xf32>
    %c0_92 = arith.constant 0 : index
    %c0_93 = arith.constant 0 : index
    %c0_94 = arith.constant 0 : index
    %234 = vector.load %arg10[%c0_92, %c0_93, %c0_94] : memref<1x16x64xf32, #tpu.memory_space<vmem>>, vector<1x16x64xf32>
    %235 = vector.shape_cast %234 : vector<1x16x64xf32> to vector<16x64xf32>
    %236 = vector.shape_cast %233 : vector<16x64xf32> to vector<1x16x64xf32>
    tpu.vector_store %arg10[%c0_92, %c0_93, %c0_94], %236 {strides = array<i32>} : memref<1x16x64xf32, #tpu.memory_space<vmem>>, vector<1x16x64xf32>,
    return
  }
  func.func @transform_0(%arg0: i32) -> (i32, i32, i32) {
    %c0_i32 = arith.constant 0 : i32
    %c0_i32_0 = arith.constant 0 : i32
    %c0_i32_1 = arith.constant 0 : i32
    return %arg0, %c0_i32, %c0_i32_0 : i32, i32, i32
  }
  func.func @transform_1(%arg0: i32) -> (i32, i32) {
    %c0_i32 = arith.constant 0 : i32
    %c0_i32_0 = arith.constant 0 : i32
    %c0_i32_1 = arith.constant 0 : i32
    return %c0_i32, %c0_i32_0 : i32, i32
  }
  func.func @transform_2(%arg0: i32) -> (i32, i32) {
    %c0_i32 = arith.constant 0 : i32
    %c0_i32_0 = arith.constant 0 : i32
    %c0_i32_1 = arith.constant 0 : i32
    return %c0_i32, %c0_i32_0 : i32, i32
  }
  func.func @transform_3(%arg0: i32) -> (i32, i32) {
    %c0_i32 = arith.constant 0 : i32
    %c0_i32_0 = arith.constant 0 : i32
    %c0_i32_1 = arith.constant 0 : i32
    return %c0_i32, %c0_i32_0 : i32, i32
  }
  func.func @transform_4(%arg0: i32) -> (i32, i32) {
    %c0_i32 = arith.constant 0 : i32
    %c0_i32_0 = arith.constant 0 : i32
    %c0_i32_1 = arith.constant 0 : i32
    return %c0_i32, %c0_i32_0 : i32, i32
  }
  func.func @transform_5(%arg0: i32) -> (i32, i32) {
    %c0_i32 = arith.constant 0 : i32
    %c0_i32_0 = arith.constant 0 : i32
    %c0_i32_1 = arith.constant 0 : i32
    return %c0_i32, %c0_i32_0 : i32, i32
  }
  func.func @transform_6(%arg0: i32) -> (i32, i32) {
    %c0_i32 = arith.constant 0 : i32
    %c0_i32_0 = arith.constant 0 : i32
    %c0_i32_1 = arith.constant 0 : i32
    return %c0_i32, %c0_i32_0 : i32, i32
  }
  func.func @transform_7(%arg0: i32) -> (i32, i32) {
    %c0_i32 = arith.constant 0 : i32
    %c0_i32_0 = arith.constant 0 : i32
    %c0_i32_1 = arith.constant 0 : i32
    return %c0_i32, %c0_i32_0 : i32, i32
  }
  func.func @transform_8(%arg0: i32) -> (i32, i32) {
    %c0_i32 = arith.constant 0 : i32
    %c0_i32_0 = arith.constant 0 : i32
    %c0_i32_1 = arith.constant 0 : i32
    return %c0_i32, %c0_i32_0 : i32, i32
  }
  func.func @transform_9(%arg0: i32) -> (i32, i32, i32) {
    %c0_i32 = arith.constant 0 : i32
    %c0_i32_0 = arith.constant 0 : i32
    %c0_i32_1 = arith.constant 0 : i32
    return %arg0, %c0_i32, %c0_i32_0 : i32, i32, i32
  }
}

</mosaic_0001>

<bundles_post_ra>
// kernel: down_forward.1
= control target key start
LH: loop header
LB: loop body
LE: loop exit
PB: predicated region body
PF: predicated region fallthrough
CT: control target
= control target key end

     0   :  { %s1270_s30 = smov 0   ;;  %s1498_s0 = inlined_call_operand.vmem [shape: f32[2,8,64], index: 0, kind: input, shape index: {}]   ;;  %s1499_s1 = inlined_call_operand.vmem [shape: bf16[16,72], index: 1, kind: input, shape index: {}]   ;;  %s1500_s2 = inlined_call_operand.vmem [shape: f32[16,1], index: 2, kind: input, shape index: {}]   ;;  %s1501_s3 = inlined_call_operand.vmem [shape: bf16[16,144], index: 3, kind: input, shape index: {}]   ;;  %s1502_s4 = inlined_call_operand.vmem [shape: f32[16,1], index: 4, kind: input, shape index: {}]   ;;  %s1503_s5 = inlined_call_operand.vmem [shape: bf16[16,8], index: 5, kind: input, shape index: {}]   ;;  %s1504_s6 = inlined_call_operand.vmem [shape: f32[16,1], index: 6, kind: input, shape index: {}]   ;;  %s1505_s7 = inlined_call_operand.vmem [shape: f32[2,16], index: 7, kind: input, shape index: {}]   ;;  %s1506_s8 = inlined_call_operand.vmem [shape: f32[16,2], index: 8, kind: input, shape index: {}]   ;;  %s1507_s9 = inlined_call_operand.vmem [shape: f32[2,16,64], index: 9, kind: output, shape index: {}]  }
   0x1 LB: > { %s998_s10 = sadd.s32 4294967295, %s1204_s30   ;;  %p1002_p0 = scmp.ge.s32.totalorder %s1204_s30, 1  ;;  %s1204_s30 = sphi %s1270_s30, %s19_s30  }
   0x2   : > { %p286_p1 = scmp.lt.s32.totalorder %s1204_s30, 3 }
   0x4   : > { %p287_p2 = pnand %p1002_p0, %p286_p1 }
   0x5   : > { %p321_p3 = scmp.lt.s32.totalorder (!%p287_p2), %s998_s10, 1  ;;  %s1206_s15 = smov (!%p287_p2), 64   ;;  %vm388_vm0 = vcmask (!%p287_p2), 1048064   ;;  %v1207_v3 = vmov (!%p287_p2), 0.0   ;;  %vm1214_vm1 = vmmov (!%p287_p2), 0   ;;  %v449_v6 = vld [vmem:[%s1500_s2] sm:$0xff] (!%p287_p2)  ;;  %v332_v9 = vlaneseq (!%p287_p2) }
   0x6   : > { %290 = sbr.rel (%p287_p2) target bundleno = 1965 (0x7ad), region = 56  ;;  %1070 = vmatprep.subr.bf16.mxu0 (!%p287_p2), %v1207_v3  ;;  %s1208_s16 = smov (!%p287_p2), 71   ;;  %1080 = vmatprep.mubr.msk.bf16.mxu0 (!%p287_p2), %vm1214_vm1, %v1207_v3  ;;  %v1216_v7 = vmov (!%p287_p2), 0   ;;  %v450_v8 = vld [vmem:[%s1500_s2 + $0x8] sm:$0xff] (!%p287_p2)  ;;  %v1185_v44 = vld [vmem:[%s1499_s1] sm:$0xff] (!%p287_p2)  }
   0x7   : > { %s1209_s17 = smov (!%p287_p2), 73   ;;  %s1210_s18 = smov (!%p287_p2), 127   ;;  %1133 = vset.pattern.permute.xlu0 (!%p287_p2), %v1216_v7  ;;  %1134 = vset.pattern.permute.xlu1 (!%p287_p2), %v1216_v7  ;;  %v333_v10 = vand.u32 (!%p287_p2), 127, %v332_v9  ;;  %v676_v9 = vld [vmem:[%s1504_s6 + $0x8] sm:$0xff] (!%p287_p2) }
   0x8   : > { %s1211_s19 = smov (!%p287_p2), 72   ;;  %s1212_s20 = smov (!%p287_p2), 120   ;;  %631 = vmatprep.subr.bf16.mxu1 (!%p287_p2), %v1216_v7 }
   0x9   : > { %s1213_s21 = smov (!%p287_p2), 65   ;;  %s1215_s22 = smov (!%p287_p2), 121   ;;  %v346_v11 = vadd.s32 (!%p287_p2), 4294967287, %v333_v10  ;;  %v338_v12 = vand.u32 (!%p287_p2), 7, %v333_v10  ;;  %v352_v13 = vadd.s32 (!%p287_p2), 4294967288, %v333_v10  ;;  %v356_v14 = vadd.s32 (!%p287_p2), 4294967289, %v333_v10 }
   0xa   : > { %s1217_s25 = smov (!%p287_p2), 119   ;;  %v362_v15 = vadd.s32 (!%p287_p2), 4294967295, %v333_v10  ;;  %v367_v21 = vadd.s32 (!%p287_p2), 1, %v333_v10  ;;  %v372_v27 = vadd.s32 (!%p287_p2), 7, %v333_v10  ;;  %v381_v28 = vadd.s32 (!%p287_p2), 9, %v333_v10 }
   0xb   : > { %vm347_vm2 = vcmp.ge.s32.totalorder (!%p287_p2), %v346_v11, 0  ;;  %vm348_vm3 = vcmp.lt.s32.totalorder (!%p287_p2), %v346_v11, 64  ;;  %vm1313_vm5 = vcmp.gt.s32.totalorder (!%p287_p2), %v338_v12, 0  ;;  %vm353_vm6 = vcmp.ge.s32.totalorder (!%p287_p2), %v352_v13, 0 }
   0xc   : > { %vm349_vm4 = vmand (!%p287_p2), %vm347_vm2, %vm348_vm3  ;;  %vm354_vm7 = vcmp.lt.s32.totalorder (!%p287_p2), %v352_v13, 64  ;;  %vm357_vm8 = vcmp.ge.s32.totalorder (!%p287_p2), %v356_v14, 0  ;;  %vm358_vm9 = vcmp.lt.s32.totalorder (!%p287_p2), %v356_v14, 64  ;;  %vm363_vm11 = vcmp.ge.s32.totalorder (!%p287_p2), %v362_v15, 0  ;;  %v1189_v14 = vld [vmem:[%s1503_s5] sm:$0xff] (!%p287_p2)  }
   0xd   : > { %s1527_s10 = smov (!%p321_p3, %s998_s10), 1  ;;  %vm1319_vm10 = vmand %vm349_vm4, %vm1313_vm5  ;;  %vm364_vm12 = vcmp.lt.s32.totalorder %v362_v15, 64  ;;  %vm1327_vm15 = vcmp.lt.s32.totalorder %v338_v12, 7  ;;  %v1358_v32 = vadd.s32 8, %v333_v10  ;;  %v675_v10 = vld [vmem:[%s1504_s6] sm:$0xff] }
   0xe   : > { %s1003_s11 = sshll.u32 %s1527_s10, 3  ;;  %vm1323_vm13 = vmand %vm353_vm6, %vm354_vm7  ;;  %vm369_vm7 = vcmp.lt.s32.totalorder %v367_v21, 64  ;;  %v1188_v12 = vld [vmem:[%s1501_s3 + $0x4] ss:$8 sps:$4 sm:$0xff]   ;;  %s1055_s12 = sshll.u32 %s1527_s10, 4 }
   0xf   : > { %s324_s14 = scalar_lea.vmem %s1498_s0, %s1003_s11  ;;  %vm359_vm14 = vmand %vm357_vm8, %vm358_vm9 }
  0x10   : > { %v1284_v0 = vld [vmem:[%s324_s14] sm:$0xff]  ;;  %vm365_vm2 = vmand %vm363_vm11, %vm364_vm12  ;;  %vm374_vm11 = vcmp.lt.s32.totalorder %v372_v27, 64  ;;  %vm383_vm12 = vcmp.lt.s32.totalorder %v381_v28, 64 }
  0x11   : > { %389 = vrot.lane.b32.xlu0 %v1284_v0, %s1206_s15  ;;  %vm1007_vm3 = vmpackc.low %vm1323_vm13, %vm1319_vm10  ;;  %v674_v11 = vpack.c.bf16 %v1284_v0, %v1284_v0 }
  0x12   : > { %vm1337_vm4 = vmand %vm359_vm14, %vm1327_vm15  ;;  %vm1218_vm14 = vmmov 1  }
  0x13   : > { %vm1343_vm6 = vmand %vm365_vm2, %vm1313_vm5 }
  0x14   : > { %vm1010_vm8 = vmpackc.low %vm1343_vm6, %vm1337_vm4 }
  0x15   : > { %vm1354_vm9 = vmand %vm369_vm7, %vm1327_vm15  ;;  %vm379_vm7 = vcmp.lt.s32.totalorder %v1358_v32, 64 }
  0x16   : > { %vm1013_vm2 = vmpackc.low %vm1354_vm9, %vm1218_vm14 }
  0x17   : > { %vm1022_vm14 = vmpackc.low %vm1319_vm10, %vm1319_vm10 }
  0x18   : > { %vm1031_vm10 = vmpackc.low %vm1343_vm6, %vm1343_vm6 }
  0x19   : > { %vm1040_vm6 = vmpackc.low %vm379_vm7, %vm379_vm7 }
  0x83   : > { %v390_v1 = vpop.permute.xlu0 %389 }
  0x84   : > { %v391_v2 = vsel %vm388_vm0, %v390_v1, %v1284_v0 }
  0x85   : > { %392 = vrot.lane.b32.xlu0 %v391_v2, %s1206_s15 }
  0xf7   : > { %v393_v4 = vpop.permute.xlu0 %392 }
  0xf8   : > { %v394_v5 = vsel %vm388_vm0, %v393_v4, %v1284_v0 }
  0xf9   : > { %410 = vrot.lane.b32.xlu0 %v394_v5, %s1208_s16  ;;  %398 = vrot.lane.b32.xlu1 %v394_v5, %s1209_s17 }
  0xfd   : > { %422 = vrot.lane.b32.xlu0 %v394_v5, %s1210_s18  ;;  %404 = vrot.lane.b32.xlu1 %v394_v5, %s1211_s19 }
 0x101   : > { %434 = vrot.lane.b32.xlu0 %v394_v5, %s1212_s20  ;;  %416 = vrot.lane.b32.xlu1 %v394_v5, %s1213_s21 }
 0x105   : > { %428 = vrot.lane.b32.xlu1 %v394_v5, %s1215_s22  ;;  %453 = vperm.xlu0 %1133, %v449_v6   ;;  %v607_v6 = vld [vmem:[%s1502_s4 + $0x8] sm:$0xff] }
 0x109   : > { %440 = vrot.lane.b32.xlu1 %v394_v5, %s1217_s25 }
 0x10d   : > { %458 = vperm.xlu1 %1134, %v450_v8   ;;  %v606_v8 = vld [vmem:[%s1502_s4] sm:$0xff] }
 0x16b   : > { %v399_v18 = vpop.permute.xlu1 %398  ;;  %v411_v22 = vpop.permute.xlu0 %410 }
 0x16f   : > { %v405_v23 = vpop.permute.xlu1 %404  ;;  %v423_v33 = vpop.permute.xlu0 %422 }
 0x170   : > { %v1008_v25 = vpack.c.bf16 %v405_v23, %v399_v18  ;;  %v1014_v35 = vpack.c.bf16 %v423_v33, %v1284_v0 }
 0x172   : > { %1071 = vmatpush3.bf16.msk.msra.mxu0 %vm1007_vm3, %v1008_v25  ;;  %vm1366_vm3 = vmand %vm374_vm11, %vm1313_vm5  ;;  %vm466_vm11 = vcmask 588800  }
 0x173   : > { %v417_v29 = vpop.permute.xlu1 %416  ;;  %1072 = vmatprep.subr.bf16.mxu0 %v1207_v3  ;;  %v435_v38 = vpop.permute.xlu0 %434  ;;  %vm1016_vm5 = vmpackc.low %vm379_vm7, %vm1366_vm3  ;;  %vm831_vm7 = vcmask 15360  }
 0x174   : > { %v1011_v30 = vpack.c.bf16 %v417_v29, %v411_v22 }
 0x176   : > { %1073 = vmatpush3.bf16.msk.msra.mxu0 %vm1010_vm8, %v1011_v30  ;;  %vm1373_vm8 = vmand %vm383_vm12, %vm1327_vm15  ;;  %vm470_vm15 = vcmask 1043456   ;;  %vm692_vm12 = vcmask 64512  }
 0x177   : > { %v429_v34 = vpop.permute.xlu1 %428  ;;  %1074 = vmatprep.subr.bf16.mxu0 %v1207_v3  ;;  %v697_v13 = vsel %vm470_vm15, %v674_v11, 0 }
 0x178   : > { %v1017_v40 = vpack.c.bf16 %v435_v38, %v429_v34 }
 0x17a   : > { %1075 = vmatpush3.bf16.msk.msra.mxu0 %vm1013_vm2, %v1014_v35  ;;  %vm1025_vm2 = vmpackc.low %vm1323_vm13, %vm1323_vm13 }
 0x17b   : > { %v441_v39 = vpop.permute.xlu1 %440  ;;  %1076 = vmatprep.subr.bf16.mxu0 %v1207_v3  ;;  %vm1034_vm13 = vmpackc.low %vm1354_vm9, %vm1354_vm9 }
 0x17c   : > { %v443_v41 = vsel %vm1373_vm8, %v441_v39, 0.0  ;;  %vm1043_vm9 = vmpackc.low %vm1373_vm8, %vm1373_vm8  ;;  %vm838_vm8 = vcmask 1041408  }
 0x17d   : > { %v448_v42 = vpack.c.bf16 %v443_v41, %v443_v41 }
 0x17e   : > { %1077 = vmatpush3.bf16.msk.msra.mxu0 %vm1016_vm5, %v1017_v40 }
 0x17f   : > { %1078 = vmatprep.subr.bf16.mxu0 %v1207_v3  ;;  %v472_v43 = vsel %vm470_vm15, %v448_v42, 0 }
 0x182   : > { %1079 = vmatpush3.bf16.msra.mxu0 %v472_v43 }
 0x183   : > { %1084 = vmatprep.subr.bf16.mxu0 %v1207_v3 }
 0x184   : > { %v454_v45 = vpop.permute.xlu0 %453 }
 0x185   : > { %1081 = vmatmul.mubr.msk.bf16.vlgmr.msra.gmra.mrb[0].mxu0 %vm466_vm11, %v1185_v44 }
 0x186   : > { %1086 = vmatprep.mubr.msk.bf16.mxu0 %vm1214_vm1, %v1207_v3  ;;  %1085 = vmatpush3.bf16.msra.mxu0 %v697_v13  ;;  %v754_v13 = vld [vmem:[%s1505_s7] sm:$0x3] }
 0x18c   : > { %v459_v47 = vpop.permute.xlu1 %458 }
 0x18d   : > { %1087 = vmatmul.mubr.msk.bf16.vlgmr.msra.gmra.mrb[4].mxu0 %vm692_vm12, %v1189_v14  ;;  %v829_v14 = vld [vmem:[%s1506_s8] sm:$0xff] }
 0x18e   : > { %1094 = vmatprep.mubr.msk.f32.mxu0 %vm1214_vm1, %v1207_v3  ;;  %vm1028_vm1 = vmpackc.low %vm1337_vm4, %vm1337_vm4 }
 0x18f   : > { %vm1037_vm4 = vmpackc.low %vm1366_vm3, %vm1366_vm3  ;;  %vm744_vm3 = vcmask 523264  }
 0x258   : > { %v508_v46 = vpop.f32.mrb[0].mxu0 }
 0x259   : > { %v509_v48 = vadd.f32 %v508_v46, %v454_v45  ;;  %v1082_v49 = vpop.f32.mrb[1].mxu0 }
 0x25a   : > { %v511_v50 = vpop.f32.mrb[2].mxu0 }
 0x25b   : > { %v512_v51 = vadd.f32 %v511_v50, %v459_v47  ;;  %v1083_v52 = vpop.f32.mrb[3].mxu0  ;;  %v1392_v53 = vmax.f32 %v509_v48, 0.0  ;;  %v1186_v48 = vld [vmem:[%s1501_s3] ss:$8 sps:$4 sm:$0xff]  }
 0x25d   : > { %v1394_v54 = vmax.f32 %v512_v51, 0.0 }
 0x25f   : > { %v1135_v55 = vpack.i.bf16 %v1394_v54, %v1392_v53  ;;  %v601_v24 = vpack.c.bf16 %v1394_v54, %v1392_v53 }
 0x260   : > { %v733_v32 = vpop.f32.mrb[4].mxu0 }
 0x261   : > { %1136 = vrot.lane.b32.xlu1 %v1135_v55, %s1206_s15  ;;  %v1088_v49 = vpop.f32.mrb[5].mxu0 }
 0x262   : > { %v736_v50 = vpop.f32.mrb[6].mxu0 }
 0x263   : > { %v1089_v51 = vpop.f32.mrb[7].mxu0 }
 0x2d3   : > { %v1137_v56 = vpop.permute.xlu1 %1136 }
 0x2d4   : > { %v1139_v57 = vunpack.i.h.bf16 %v1137_v56  ;;  %v1138_v58 = vunpack.i.l.bf16 %v1137_v56 }
 0x2d6   : > { %v521_v59 = vsel %vm388_vm0, %v1138_v58, %v1392_v53  ;;  %v524_v60 = vsel %vm388_vm0, %v1139_v57, %v1394_v54 }
 0x2d7   : > { %v1140_v61 = vpack.i.bf16 %v524_v60, %v521_v59 }
 0x2d9   : > { %1141 = vrot.lane.b32.xlu0 %v1140_v61, %s1206_s15  ;;  %s329_s15 = scalar_lea.vmem %s1507_s9, %s1055_s12 }
 0x34b   : > { %v1142_v62 = vpop.permute.xlu0 %1141 }
 0x34c   : > { %v1144_v63 = vunpack.i.h.bf16 %v1142_v62  ;;  %v1143_v1 = vunpack.i.l.bf16 %v1142_v62 }
 0x34e   : > { %v530_v2 = vsel %vm388_vm0, %v1144_v63, %v1394_v54  ;;  %v529_v4 = vsel %vm388_vm0, %v1143_v1, %v1392_v53  ;;  %vm627_vm0 = vcmask 130048  }
 0x34f   : > { %v1150_v5 = vpack.i.bf16 %v530_v2, %v529_v4  ;;  %1046 = vmatprep.mubr.msk.bf16.mxu1 %vm627_vm0, %v1188_v12 }
 0x351   : > { %1151 = vrot.lane.b32.xlu0 %v1150_v5, %s1211_s19  ;;  %1146 = vrot.lane.b32.xlu1 %v1150_v5, %s1209_s17 }
 0x355   : > { %1161 = vrot.lane.b32.xlu0 %v1150_v5, %s1213_s21  ;;  %1156 = vrot.lane.b32.xlu1 %v1150_v5, %s1208_s16 }
 0x359   : > { %1171 = vrot.lane.b32.xlu0 %v1150_v5, %s1215_s22  ;;  %1166 = vrot.lane.b32.xlu1 %v1150_v5, %s1210_s18 }
 0x35d   : > { %1181 = vrot.lane.b32.xlu0 %v1150_v5, %s1217_s25  ;;  %1176 = vrot.lane.b32.xlu1 %v1150_v5, %s1212_s20 }
 0x361   : > { %615 = vperm.xlu0 %1133, %v607_v6   ;;  %610 = vperm.xlu1 %1134, %v606_v8   ;;  %v1219_v6 = vmov 0.0|0.0  }
 0x362   : > { %1102 = vmatprep.subr.bf16.mxu0 %v1219_v6 }
 0x365   : > { %684 = vperm.xlu0 %1133, %v676_v9   ;;  %679 = vperm.xlu1 %1134, %v675_v10  }
 0x3c3   : > { %v1152_v0 = vpop.permute.xlu0 %1151  ;;  %v1147_v15 = vpop.permute.xlu1 %1146 }
 0x3c4   : > { %v1149_v16 = vunpack.i.h.bf16 %v1147_v15  ;;  %v1148_v18 = vunpack.i.l.bf16 %v1147_v15  ;;  %v1154_v20 = vunpack.i.h.bf16 %v1152_v0  ;;  %v1153_v21 = vunpack.i.l.bf16 %v1152_v0 }
 0x3c6   : > { %v1023_v22 = vpack.c.bf16 %v1149_v16, %v1148_v18  ;;  %v1026_v3 = vpack.c.bf16 %v1154_v20, %v1153_v21  ;;  %v830_v18 = vld [vmem:[%s1506_s8 + $0x8] sm:$0xff] }
 0x3c7   : > { %v1157_v23 = vpop.permute.xlu1 %1156  ;;  %v1162_v28 = vpop.permute.xlu0 %1161 }
 0x3c8   : > { %1024 = vmatpush1.bf16.msk.msra.mxu1 %vm1022_vm14, %v1023_v22  ;;  %v1159_v25 = vunpack.i.h.bf16 %v1157_v23  ;;  %v1158_v27 = vunpack.i.l.bf16 %v1157_v23  ;;  %v1164_v17 = vunpack.i.h.bf16 %v1162_v28  ;;  %v1163_v29 = vunpack.i.l.bf16 %v1162_v28 }
 0x3c9   : > { %633 = vmatprep.subr.bf16.mxu1 %v1216_v7 }
 0x3ca   : > { %v1029_v30 = vpack.c.bf16 %v1159_v25, %v1158_v27  ;;  %v1032_v19 = vpack.c.bf16 %v1164_v17, %v1163_v29 }
 0x3cb   : > { %v1167_v33 = vpop.permute.xlu1 %1166  ;;  %v1172_v38 = vpop.permute.xlu0 %1171 }
 0x3cc   : > { %1027 = vmatpush1.bf16.msk.msra.mxu1 %vm1025_vm2, %v1026_v3  ;;  %v1169_v34 = vunpack.i.h.bf16 %v1167_v33  ;;  %v1168_v35 = vunpack.i.l.bf16 %v1167_v33  ;;  %v1174_v26 = vunpack.i.h.bf16 %v1172_v38  ;;  %v1173_v39 = vunpack.i.l.bf16 %v1172_v38 }
 0x3cd   : > { %635 = vmatprep.subr.bf16.mxu1 %v1216_v7 }
 0x3ce   : > { %v1035_v40 = vpack.c.bf16 %v1169_v34, %v1168_v35  ;;  %v1038_v42 = vpack.c.bf16 %v1174_v26, %v1173_v39 }
 0x3cf   : > { %v1177_v41 = vpop.permute.xlu1 %1176  ;;  %v1182_v45 = vpop.permute.xlu0 %1181 }
 0x3d0   : > { %1030 = vmatpush1.bf16.msk.msra.mxu1 %vm1028_vm1, %v1029_v30  ;;  %v1179_v43 = vunpack.i.h.bf16 %v1177_v41  ;;  %v1178_v44 = vunpack.i.l.bf16 %v1177_v41  ;;  %v1184_v31 = vunpack.i.h.bf16 %v1182_v45  ;;  %v1183_v46 = vunpack.i.l.bf16 %v1182_v45 }
 0x3d1   : > { %637 = vmatprep.subr.bf16.mxu1 %v1216_v7 }
 0x3d2   : > { %v1041_v47 = vpack.c.bf16 %v1179_v43, %v1178_v44  ;;  %v1044_v36 = vpack.c.bf16 %v1184_v31, %v1183_v46 }
 0x3d4   : > { %1033 = vmatpush1.bf16.msk.msra.mxu1 %vm1031_vm10, %v1032_v19 }
 0x3d5   : > { %639 = vmatprep.subr.bf16.mxu1 %v1216_v7 }
 0x3d8   : > { %640 = vmatpush1.bf16.msra.mxu1 %v601_v24 }
 0x3d9   : > { %641 = vmatprep.subr.bf16.mxu1 %v1216_v7 }
 0x3dc   : > { %1036 = vmatpush1.bf16.msk.msra.mxu1 %vm1034_vm13, %v1035_v40 }
 0x3dd   : > { %643 = vmatprep.subr.bf16.mxu1 %v1216_v7 }
 0x3e0   : > { %1039 = vmatpush1.bf16.msk.msra.mxu1 %vm1037_vm4, %v1038_v42  ;;  %v611_v52 = vpop.permute.xlu1 %610  ;;  %v616_v53 = vpop.permute.xlu0 %615 }
 0x3e1   : > { %645 = vmatprep.subr.bf16.mxu1 %v1216_v7 }
 0x3e4   : > { %1042 = vmatpush1.bf16.msk.msra.mxu1 %vm1040_vm6, %v1041_v47  ;;  %v680_v56 = vpop.permute.xlu1 %679  ;;  %v685_v60 = vpop.permute.xlu0 %684 }
 0x3e5   : > { %647 = vmatprep.subr.bf16.mxu1 %v1216_v7 }
 0x3e8   : > { %1045 = vmatpush1.bf16.msk.msra.mxu1 %vm1043_vm9, %v1044_v36 }
 0x3eb   : > { %664 = vmatmul.mubr.bf16.vlgmr.msra.gmra.mrb[0].mxu1 %v1186_v48 }
 0x4be   : > { %v665_v54 = vpop.f32.mrb[0].mxu1 }
 0x4bf   : > { %v666_v55 = vadd.f32 %v665_v54, %v611_v52  ;;  %v667_v37 = vpop.f32.mrb[1].mxu1 }
 0x4c0   : > { %v668_v57 = vpop.f32.mrb[2].mxu1 }
 0x4c1   : > { %v1106_v58 = vadd.f32 %v680_v56, %v666_v55  ;;  %v669_v7 = vadd.f32 %v668_v57, %v616_v53  ;;  %v670_v59 = vpop.f32.mrb[3].mxu1 }
 0x4c3   : > { %v1107_v61 = vadd.f32 %v1106_v58, %v733_v32  ;;  %v1109_v62 = vadd.f32 %v685_v60, %v669_v7 }
 0x4c5   : > { %v742_v63 = vmax.f32 %v1107_v61, 0.0  ;;  %v1110_v1 = vadd.f32 %v1109_v62, %v736_v50 }
 0x4c7   : > { %v743_v2 = vmax.f32 %v1110_v1, 0.0  ;;  %v745_v4 = vsel %vm744_vm3, %v742_v63, 0.0 }
 0x4c8   : > { %746 = vadd.xlane.f32.xlu1 %v745_v4 }
 0x4c9   : > { %v748_v5 = vsel %vm744_vm3, %v743_v2, 0.0 }
 0x4ca   : > { %749 = vadd.xlane.f32.xlu0 %v748_v5 }
 0x555   : > { %v747_v8 = vpop.xlane.xlu1 %746 }
 0x556   : > { %v752_v10 = vmul.f32 0.015625, %v747_v8 }
 0x557   : > { %v750_v9 = vpop.xlane.xlu0 %749 }
 0x558   : > { %v753_v11 = vmul.f32 0.015625, %v750_v9 }
 0x55a   : > { %v1103_v12 = vpack.c.bf16 %v753_v11, %v752_v10 }
 0x55c   : > { %1104 = vmatpush3.bf16.msra.mxu0 %v1103_v12 }
 0x55f   : > { %1095 = vmatmul.mubr.msk.f32.vlgmr.msra.gmra.mrb[8].mxu0 %vm627_vm0, %v754_v13 }
 0x560   : > { %1099 = vmatprep.mubr.msk.f32.mxu0 %vm831_vm7, %v829_v14 }
 0x632   : > { %v824_v0 = vpop.f32.mrb[8].mxu0 }
 0x633   : > { %v828_v15 = vmax.f32 %v824_v0, 0.0  ;;  %v1096_v16 = vpop.f32.mrb[9].mxu0 }
 0x635   : > { %1097 = vmatprep.subr.msk.mxu0 %vm838_vm8, %v828_v15 }
 0x636   : > { %1098 = vmatpush3.msk.msra.mxu0 %vm838_vm8, %v828_v15 }
 0x637   : > { %1100 = vmatmul.mubr.msk.f32.vlgmr.msra.gmra.mrb[10].mxu0 %vm831_vm7, %v830_v18 }
 0x70a   : > { %v1101_v20 = vpop.f32.mrb[10].mxu0 }
 0x70b   : > { %v918_v21 = vsub.f32 0.0, %v1101_v20  ;;  %v908_v22 = vpop.f32.mrb[11].mxu0 }
 0x70c   : > { %v917_v23 = vsub.f32 0.0, %v908_v22 }
 0x70d   : > { %v921_v3 = vmul.f32 1.442695, %v918_v21 }
 0x70e   : > { %v919_v25 = vmul.f32 1.442695, %v917_v23 }
 0x70f   : > { %1190 = vpow2.f32 %v921_v3 }
 0x710   : > { %1192 = vpow2.f32 %v919_v25 }
 0x719   : > { %v1191_v27 = vpop.eup %1190 }
 0x71a   : > { %v1193_v28 = vpop.eup %1192  ;;  %v924_v17 = vadd.f32 1.0, %v1191_v27 }
 0x71b   : > { %v923_v29 = vadd.f32 1.0, %v1193_v28 }
 0x71c   : > { %1194 = vrcp.f32 %v924_v17 }
 0x71d   : > { %1196 = vrcp.f32 %v923_v29 }
 0x726   : > { %v1195_v30 = vpop.eup %1194 }
 0x727   : > { %v1197_v19 = vpop.eup %1196  ;;  %v928_v33 = vadd.f32 1.0, %v1195_v30 }
 0x728   : > { %v927_v34 = vadd.f32 1.0, %v1197_v19 }
 0x729   : > { %936 = vperm.xlu1 %1134, %v928_v33  }
 0x72a   : > { %931 = vperm.xlu0 %1133, %v927_v34  }
 0x7a8   : > { %v937_v35 = vpop.permute.xlu1 %936 }
 0x7a9   : > { %v940_v24 = vmul.f32 %v937_v35, %v743_v2  ;;  %v932_v38 = vpop.permute.xlu0 %931 }
 0x7aa   : > { %v939_v26 = vmul.f32 %v932_v38, %v742_v63 }
 0x7ab   : > { %942 = vst.msk [vmem:[%s329_s15 + $0x8] sm:$0xff] %vm744_vm3, %v940_v24 }
 0x7ac   : > { %941 = vst.msk [vmem:[%s329_s15] sm:$0xff] %vm744_vm3, %v939_v26 }
 0x7ad PF: > { %s19_s30 = sadd.s32 1, %s1204_s30  }
 0x7ae   : > { %p16_p4 = scmp.ge.s32.totalorder %s19_s30, 4  }
 0x7b0   :  { %18 = sbr.rel (!%p16_p4) target bundleno = 1 (0x1), region = 86 }

</bundles_post_ra>
